<compile_context>
chip_gen: v5e
topology: v5e:2x2
jax: 0.10.0
libtpu: 0.0.40
codegen_flags: <defaults>
</compile_context>

<pallas_src>
from functools import partial

import jax
import jax.numpy as jnp
from jax import lax
from jax.experimental import pallas as pl
from jax.experimental.pallas import tpu as pltpu


def _channel_rmsnorm_kernel(x_ref, g_ref, o_ref, *, eps):
    # x_ref: (C, T)  one image's channels x a lane-dense spatial tile
    # g_ref: (C, 1)  pre-scaled per-channel gain (gamma * sqrt(C)), f32
    x = x_ref[...].astype(jnp.float32)
    ss = jnp.sum(x * x, axis=0, keepdims=True)          # (1, T) reduce over channels
    # 1 / max(||x||, eps)  ==  rsqrt(max(sum(x^2), eps^2))   (ss >= 0)
    inv = lax.rsqrt(jnp.maximum(ss, eps * eps))
    o_ref[...] = (x * inv * g_ref[...]).astype(o_ref.dtype)


def channel_rms_norm(x, gamma, *, eps=1e-12, tile_hw=2048):
    """ChannelRMSNorm forward. x: (N, C, H, W), gamma: (C,) -> (N, C, H, W)."""
    N, C, H, W = x.shape
    HW = H * W

    # Fold sqrt(C) into gamma on the wrapper side (C elements, negligible cost).
    g = gamma.reshape(C, 1).astype(jnp.float32) * (float(C) ** 0.5)

    # Native NCHW: free contiguous reshape; spatial dim goes on the lane axis.
    x3d = x.reshape(N, C, HW)

    # Spatial tile: a multiple of 128 lanes, capped so in+out (double-buffered)
    # stays comfortably inside every generation's scoped-VMEM budget.
    itemsize = jnp.dtype(x.dtype).itemsize
    budget = 12 * 1024 * 1024                       # bytes for x + out, 2x buffered
    max_t = max(128, budget // (4 * C * itemsize))
    t = max(128, (min(int(tile_hw), int(max_t)) // 128) * 128)
    T = HW if HW <= t else t                        # full extent is always legal
    grid = (N, pl.cdiv(HW, T))

    out3d = pl.pallas_call(
        partial(_channel_rmsnorm_kernel, eps=eps),
        out_shape=jax.ShapeDtypeStruct((N, C, HW), x.dtype),
        grid_spec=pltpu.PrefetchScalarGridSpec(
            num_scalar_prefetch=0,
            grid=grid,
            in_specs=[
                pl.BlockSpec((pl.Squeezed(), C, T), lambda n, j: (n, 0, j)),
                pl.BlockSpec((C, 1), lambda n, j: (0, 0)),
            ],
            out_specs=pl.BlockSpec((pl.Squeezed(), C, T), lambda n, j: (n, 0, j)),
        ),
        compiler_params=pltpu.CompilerParams(
            dimension_semantics=("parallel", "parallel"),
            vmem_limit_bytes=32 << 20,              # lift v5e's 16 MiB scoped default
        ),
    )(x3d, g)

    return out3d.reshape(N, C, H, W)


if __name__ == "__main__":
    key = jax.random.PRNGKey(0)
    kx, kg = jax.random.split(key)
    N, C, H, W = 2, 4, 16, 16

    x = jax.random.normal(kx, (N, C, H, W), dtype=jnp.float32)
    # nn.Parameter(torch.ones(dim, 1, 1)); perturb slightly to exercise broadcast.
    gamma = jnp.ones((C,), dtype=jnp.float32) + 0.1 * jax.random.normal(kg, (C,), dtype=jnp.float32)

    out = channel_rms_norm(x, gamma)
    out = jax.block_until_ready(out)

    # Pure-JAX reference of the PyTorch forward semantics.
    norm = jnp.sqrt(jnp.sum(x * x, axis=1, keepdims=True))
    ref = x / jnp.maximum(norm, 1e-12) * (C ** 0.5) * gamma.reshape(1, C, 1, 1)
    assert out.shape == (N, C, H, W)
    assert jnp.allclose(out, ref, atol=1e-5, rtol=1e-5)

    print("KERNEL_OK")
</pallas_src>

<mosaic_0001>
module attributes {stable_mosaic.version = 11 : i64} {
  func.func @_channel_rmsnorm_kernel(%arg0: i32, %arg1: i32, %arg2: memref<1x4x256xf32, #tpu.memory_space<vmem>>, %arg3: memref<4x1xf32, #tpu.memory_space<vmem>>, %arg4: memref<1x4x256xf32, #tpu.memory_space<vmem>>) attributes {dimension_semantics = [#tpu.dimension_semantics<parallel>, #tpu.dimension_semantics<parallel>], iteration_bounds = array<i64: 2, 1>, scalar_prefetch = 0 : i64, scratch_operands = 0 : i64, tpu.core_type = #tpu.core_type<tc>, window_params = [{transform_indices = @transform_0, window_bounds = array<i64: 1, 4, 256>}, {pipeline_mode = #tpu.pipeline_mode<synchronous>, transform_indices = @transform_1, window_bounds = array<i64: 4, 1>}, {transform_indices = @transform_2, window_bounds = array<i64: 1, 4, 256>}]} {
    %c0 = arith.constant 0 : index
    %c0_0 = arith.constant 0 : index
    %c0_1 = arith.constant 0 : index
    %0 = vector.load %arg2[%c0, %c0_0, %c0_1] : memref<1x4x256xf32, #tpu.memory_space<vmem>>, vector<1x4x256xf32>
    %1 = vector.shape_cast %0 : vector<1x4x256xf32> to vector<4x256xf32>
    %2 = arith.mulf %1, %1 : vector<4x256xf32>
    %cst = arith.constant dense<0.000000e+00> : vector<256xf32>
    %3 = vector.multi_reduction <add>, %2, %cst [0] : vector<4x256xf32> to vector<256xf32>
    %4 = vector.shape_cast %3 : vector<256xf32> to vector<1x256xf32>
    %cst_2 = arith.constant 1.000000e-24 : f32
    %5 = vector.broadcast %cst_2 : f32 to vector<1x256xf32>
    %6 = arith.maximumf %4, %5 : vector<1x256xf32>
    %7 = math.rsqrt %6 : vector<1x256xf32>
    %8 = vector.broadcast %7 : vector<1x256xf32> to vector<4x256xf32>
    %9 = arith.mulf %1, %8 : vector<4x256xf32>
    %c0_3 = arith.constant 0 : index
    %c0_4 = arith.constant 0 : index
    %10 = vector.load %arg3[%c0_3, %c0_4] : memref<4x1xf32, #tpu.memory_space<vmem>>, vector<4x1xf32>
    %11 = vector.broadcast %10 : vector<4x1xf32> to vector<4x256xf32>
    %12 = arith.mulf %9, %11 : vector<4x256xf32>
    %c0_5 = arith.constant 0 : index
    %c0_6 = arith.constant 0 : index
    %c0_7 = arith.constant 0 : index
    %13 = vector.load %arg4[%c0_5, %c0_6, %c0_7] : memref<1x4x256xf32, #tpu.memory_space<vmem>>, vector<1x4x256xf32>
    %14 = vector.shape_cast %13 : vector<1x4x256xf32> to vector<4x256xf32>
    %15 = vector.shape_cast %12 : vector<4x256xf32> to vector<1x4x256xf32>
    tpu.vector_store %arg4[%c0_5, %c0_6, %c0_7], %15 {strides = array<i32>} : memref<1x4x256xf32, #tpu.memory_space<vmem>>, vector<1x4x256xf32>,
    return
  }
  func.func @transform_0(%arg0: i32, %arg1: i32) -> (i32, i32, i32) {
    %c0_i32 = arith.constant 0 : i32
    %c0_i32_0 = arith.constant 0 : i32
    return %arg0, %c0_i32, %arg1 : i32, i32, i32
  }
  func.func @transform_1(%arg0: i32, %arg1: i32) -> (i32, i32) {
    %c0_i32 = arith.constant 0 : i32
    %c0_i32_0 = arith.constant 0 : i32
    %c0_i32_1 = arith.constant 0 : i32
    return %c0_i32, %c0_i32_0 : i32, i32
  }
  func.func @transform_2(%arg0: i32, %arg1: i32) -> (i32, i32, i32) {
    %c0_i32 = arith.constant 0 : i32
    %c0_i32_0 = arith.constant 0 : i32
    return %arg0, %c0_i32, %arg1 : i32, i32, i32
  }
}

</mosaic_0001>

<bundles_post_ra>
// kernel: tpu_custom_call.1
= control target key start
LH: loop header
LB: loop body
LE: loop exit
PB: predicated region body
PF: predicated region fallthrough
CT: control target
= control target key end

     0   :  { %7 = vsyncpa [#allocation3], 0  ;;  %s695_s0 = inlined_call_operand.hbm [shape: f32[2,4,256], index: 0, kind: input, shape index: {}]   ;;  %s696_s1 = inlined_call_operand.vmem [shape: f32[4,1], index: 1, kind: input, shape index: {}]   ;;  %s697_s2 = inlined_call_operand.hbm [shape: f32[2,4,256], index: 2, kind: output, shape index: {}]  }
   0x1   :  { %9 = vsyncpa [#allocation3 + $0x1], 0 }
   0x2   :  { %10 = vsyncpa [#allocation4], 0 }
   0x3   :  { %12 = vsyncpa [#allocation4 + $0x1], 0  ;;  %s565_s9 = smov 0   ;;  %s567_s10 = smov 0  }
   0x4   :  { %s569_s11 = smov 0   ;;  %s571_s12 = smov 0  }
   0x5   :  { %s573_s13 = smov 0   ;;  %s575_s14 = smov 0  }
   0x6 LB: > { %s348_s15 = sadd.s32 4294967295, %s546_s14   ;;  %s349_s16 = sadd.s32 4294967294, %s546_s14   ;;  %s546_s14 = sphi %s575_s14, %s18_s14   ;;  %s542_s13 = sphi %s573_s13, %s706_s13   ;;  %s538_s12 = sphi %s571_s12, %s705_s12   ;;  %s534_s11 = sphi %s569_s11, %s704_s11   ;;  %s530_s10 = sphi %s567_s10, %s703_s10   ;;  %s526_s9 = sphi %s565_s9, %s702_s9  }
   0x7   : > { %s30_s17 = sadd.s32 1, %s542_s13  ;;  %s39_s18 = sadd.s32 1, %s534_s11 }
   0x8   : > { %p32_p0 = scmp.ge.s32.totalorder %s30_s17, 2  ;;  %p46_p1 = scmp.ne.s32.totalorder %s534_s11, %s530_s10 }
   0x9   : > { %p47_p2 = scmp.eq.s32.totalorder %s546_s14, 0  ;;  %p52_p3 = scmp.ne.s32.totalorder %s530_s10, %s526_s9 }
   0xa   : > { %s708_s17 = smov (%p32_p0, %s30_s17), 0  ;;  %p53_p5 = scmp.eq.s32.totalorder %s348_s15, 0 }
   0xb   : > { %p606_p4 = por %p47_p2, %p46_p1  ;;  %s34_s20 = ssub.s32 %s542_s13, %s708_s17 }
   0xc   : > { %p99_p6 = scmp.eq.s32.totalorder %s348_s15, 1  ;;  %p37_p7 = scmp.eq.s32.totalorder %s34_s20, 0 }
   0xd   : > { %p612_p8 = por %p53_p5, %p52_p3  ;;  %p105_p10 = scmp.eq.s32.totalorder %s349_s16, 1 }
   0xe   : > { %p616_p9 = por %p99_p6, %p46_p1  ;;  %p351_p12 = scmp.ge.s32.totalorder %s546_s14, 2 }
   0xf   : > { %s621_s23 = scalar_select %p37_p7, %s534_s11, %s39_s18  }
  0x10   : > { %p623_p11 = por %p105_p10, %p52_p3  ;;  %p377_p13 = scmp.lt.s32.totalorder %s546_s14, 2 }
  0x11   : > { %s128_s25 = sand.u32 1, %s534_s11   ;;  %s363_s27 = sshll.u32 %s542_s13, 3 }
  0x12   : > { %s352_s26 = sshll.u32 %s128_s25, 3  ;;  %s139_s30 = scalar_lea.hbm %s695_s0, %s363_s27 }
  0x13   : > { %s132_s3 = scalar_lea.vmem [#allocation2], %s352_s26  ;;  %s141_s5 = sshll.u32 %s139_s30, 4  ;;  %s142_s5 = int_to_ptr.hbm [resolvable:$true] %s141_s5 }
  0x14   : > { %s143_s4 = sshll.u32 %s132_s3, 4  ;;  %p370_p0 = pnand %p377_p13, %p606_p4  ;;  %s144_s4 = int_to_ptr.vmem [resolvable:$true] %s143_s4 }
  0x15   : > { %p355_p1 = scmp.ge.s32.totalorder %s546_s14, 1  ;;  %p148_p2 = scmp.lt.s32.totalorder %s546_s14, 3 }
  0x16   : > { %s129_s6 = scalar_lea.sflag [#allocation3], %s128_s25 }
  0x17   : > { %372 = dma.hbm_to_vmem [thread:$0]  (!%p370_p0), %s142_s5, 128, %s144_s4, %s129_s6  }
  0x18   : > { %p149_p3 = pnand %p355_p1, %p148_p2 }
  0x19   : > { %s639_s7 = sand.u32 (!%p149_p3), 1, %s530_s10  }
  0x1a   : > { %152 = sbr.rel (%p149_p3) target bundleno = 156 (0x9c), region = 28  ;;  %s356_s8 = sshll.u32 (!%p149_p3), %s639_s7, 3 }
  0x1b   : > { %s155_s15 = scalar_lea.sflag (!%p149_p3), [#allocation3], %s639_s7  ;;  %s158_s16 = scalar_lea.vmem (!%p149_p3), [#allocation2], %s356_s8 }
  0x1f   : > { %517 = dma.done.wait (%p612_p8), %s155_s15, 128  }
  0x20   : > { %519 = vsyncadd (%p612_p8), %s155_s15, 4294967168  ;;  %v548_v0 = vmov 0   ;;  %v233_v1 = vld [vmem:[%s696_s1] sm:$0xf]  ;;  %v182_v2 = vld [vmem:[%s158_s16] sm:$0xff]  ;;  %vm190_vm0 = vcmask 1043456  }
  0x21   : > { %429 = vset.pattern.permute.xlu0 %v548_v0  ;;  %v183_v3 = vmul.f32 %v182_v2, %v182_v2  ;;  %v549_v36 = vmov 839922192   ;;  %s364_s20 = sshll.u32 %s538_s12, 3  ;;  %s179_s27 = scalar_lea.vmem [#allocation5], %s356_s8 }
  0x22   : > { %236 = vperm.xlu0 %429, %v233_v1   ;;  %v239_v37 = vunpack.c.l.s4 %v549_v36  ;;  %s259_s26 = scalar_lea.hbm %s697_s2, %s364_s20  ;;  %s261_s28 = sshll.u32 %s179_s27, 4  ;;  %s262_s28 = int_to_ptr.vmem [resolvable:$true] %s261_s28 }
  0x23   : > { %185 = vst [vmem:[#allocation1] ss:$2 sm:$0xff] %v183_v3  ;;  %s263_s29 = sshll.u32 %s259_s26, 4  ;;  %s246_s12 = scalar_lea.sflag [#allocation4], %s639_s7  ;;  %s264_s29 = int_to_ptr.hbm [resolvable:$true] %s263_s29 }
  0x24   : > { %v240_v40 = vunpack.c.0.s8 %v239_v37  ;;  %s478_s30 = sshra.s32 %s264_s29, 4  ;;  %s484_s6 = scalar_lea.hbm %s697_s2, 16  ;;  %s479_s30 = int_to_ptr.hbm [resolvable:$true] %s478_s30 }
  0x25   : > { %s480_s3 = scalar_lea.hbm %s479_s30, 8  ;;  %p485_p7 = scmp.lt.s32.totalorder %s479_s30, %s697_s2 }
  0x26   : > { %p481_p4 = scmp.ne.s32.totalorder %s479_s30, %s480_s3  ;;  %p486_p8 = scmp.lt.s32.totalorder %s484_s6, %s480_s3 }
  0x28   : > { %p482_p5 = pnand %p481_p4, %p616_p9  ;;  %p487_p10 = por %p486_p8, %p485_p7 }
  0x2a   : > { %v187_v4 = vld.sshfl [vmem:[#allocation1 + $0x8] sm:$0xff pattern:$0x75316420]  ;;  %v186_v6 = vld.sshfl [vmem:[#allocation1] sm:$0xff pattern:$0x75316420]  ;;  %p483_p6 = pneg %p482_p5 }
  0x2b   : > { %v198_v5 = vsel %vm190_vm0, %v187_v4, 0.0  ;;  %v191_v8 = vsel %vm190_vm0, %v186_v6, 0.0 }
  0x2c   : > { %v199_v7 = vrot.slane %v198_v5, 4  ;;  %v192_v9 = vrot.slane %v191_v8, 4  ;;  %p488_p13 = pnand %p487_p10, %p483_p6 }
  0x2e   : > { %v200_v10 = vadd.f32 %v199_v7, %v198_v5  ;;  %v193_v11 = vadd.f32 %v192_v9, %v191_v8 }
  0x30   : > { %v201_v12 = vrot.slane %v200_v10, 2  ;;  %v194_v13 = vrot.slane %v193_v11, 2 }
  0x32   : > { %v202_v14 = vadd.f32 %v201_v12, %v200_v10  ;;  %v195_v15 = vadd.f32 %v194_v13, %v193_v11 }
  0x34   : > { %v203_v16 = vrot.slane %v202_v14, 1  ;;  %v196_v17 = vrot.slane %v195_v15, 1 }
  0x36   : > { %v204_v18 = vadd.f32 %v203_v16, %v202_v14  ;;  %v197_v19 = vadd.f32 %v196_v17, %v195_v15 }
  0x38   : > { %v206_v20 = vmax.f32 %v204_v18, 1e-24  ;;  %v205_v21 = vmax.f32 %v197_v19, 1e-24 }
  0x3a   : > { %430 = vrsqrt.f32 %v206_v20  ;;  %vm223_vm1 = vweird.f32 %v206_v20  ;;  %vm213_vm4 = vweird.f32 %v205_v21 }
  0x3b   : > { %432 = vrsqrt.f32 %v205_v21 }
  0x40   : > { %v431_v22 = vpop.eup %430 }
  0x41   : > { %v218_v23 = vmul.f32 %v431_v22, %v206_v20  ;;  %v433_v24 = vpop.eup %432  ;;  %vm224_vm2 = vweird.f32 %v431_v22 }
  0x42   : > { %v208_v25 = vmul.f32 %v433_v24, %v205_v21  ;;  %vm225_vm3 = vmor %vm223_vm1, %vm224_vm2  ;;  %vm214_vm5 = vweird.f32 %v433_v24 }
  0x43   : > { %v219_v26 = vmul.f32 %v431_v22, %v218_v23  ;;  %vm215_vm6 = vmor %vm213_vm4, %vm214_vm5 }
  0x44   : > { %v209_v27 = vmul.f32 %v433_v24, %v208_v25 }
  0x45   : > { %v220_v28 = vmul.f32 0.5, %v219_v26 }
  0x46   : > { %v210_v29 = vmul.f32 0.5, %v209_v27 }
  0x47   : > { %v221_v30 = vsub.f32 1.5, %v220_v28 }
  0x48   : > { %v211_v31 = vsub.f32 1.5, %v210_v29 }
  0x49   : > { %v222_v32 = vmul.f32 %v431_v22, %v221_v30 }
  0x4a   : > { %v212_v33 = vmul.f32 %v433_v24, %v211_v31 }
  0x4b   : > { %v226_v34 = vsel %vm225_vm3, %v431_v22, %v222_v32 }
  0x4c   : > { %v229_v35 = vrot.slane %v226_v34, 4  ;;  %v216_v38 = vsel %vm215_vm6, %v433_v24, %v212_v33 }
  0x4e   : > { %v230_v39 = vsel %vm190_vm0, %v216_v38, %v229_v35 }
  0x4f   : > { %v232_v41 = vmul.f32 %v230_v39, %v182_v2 }
  0x94   : > { %v237_v42 = vpop.permute.xlu0 %236 }
  0x95   : > { %v241_v43 = vperm.slane %v237_v42, %v240_v40 }
  0x97   : > { %v243_v44 = vmul.f32 %v241_v43, %v232_v41 }
  0x99   : > { %244 = vst [vmem:[%s179_s27] sm:$0xff] %v243_v44 }
  0x9a   : > { %491 = shalt.err (!%p488_p13)
}
  0x9b   : > { %367 = dma.vmem_to_hbm [thread:$0]  (%p616_p9), %s262_s28, 128, %s264_s29, %s246_s12  }
  0x9c PF: > { %s275_s7 = sand.u32 1, %s526_s9   ;;  %p374_p0 = pnand %p351_p12, %p623_p11 }
  0x9d   : > { %s276_s16 = scalar_lea.sflag [#allocation4], %s275_s7 }
  0x9e   : > { %p375_p1 = pneg %p374_p0 }
  0xa0   : > { %521 = dma.done.wait (%p375_p1), %s276_s16, 128  }
  0xa1   : > { %523 = vsyncadd (%p375_p1), %s276_s16, 4294967168  ;;  %s18_s14 = sadd.s32 1, %s546_s14   ;;  %s702_s9 = smov %s530_s10 }
  0xa2   : > { %p15_p2 = scmp.ge.s32.totalorder %s18_s14, 4   ;;  %s703_s10 = smov %s534_s11 }
  0xa3   : > { %s704_s11 = smov %s621_s23  ;;  %s705_s12 = smov %s542_s13 }
  0xa4   : > { %s706_s13 = smov %s708_s17  ;;  %17 = sbr.rel (!%p15_p2) target bundleno = 6 (0x6), region = 73 }
  0xa9   :  { %282 = vsyncpa [#allocation3], 1 }
  0xaa   :  { %284 = vsyncpa [#allocation3 + $0x1], 1 }
  0xab   :  { %285 = vsyncpa [#allocation4], 1 }
  0xac   :  { %287 = vsyncpa [#allocation4 + $0x1], 1 }

</bundles_post_ra>
